<compile_context>
chip_gen: v5e
topology: v5e:2x2
jax: 0.10.0
libtpu: 0.0.40
codegen_flags: <defaults>
</compile_context>

<pallas_src>
import functools

import jax
import jax.numpy as jnp
from jax.experimental import pallas as pl
from jax.experimental.pallas import tpu as pltpu


def _make_vpu_kernel(cin, cout):
    """Tiny-channel path: unrolled VPU FMAs, weights/bias as SMEM scalars."""

    def kernel(w_ref, b_ref, x_ref, o_ref):
        # w_ref: (cout, cin) SMEM, b_ref: (cout,) SMEM
        # x_ref: (1, cin, tn) VMEM, o_ref: (1, cout, tn) VMEM
        x = x_ref[0].astype(jnp.float32)          # (cin, tn)
        for co in range(cout):                    # static unroll (cin*cout small)
            acc = x[0:1, :] * w_ref[co, 0]
            for ci in range(1, cin):
                acc = acc + x[ci:ci + 1, :] * w_ref[co, ci]
            o_ref[0, co:co + 1, :] = (acc + b_ref[co]).astype(o_ref.dtype)

    return kernel


def _mxu_kernel(w_ref, b_ref, x_ref, o_ref):
    """Large-channel path: (Cout,Cin) @ (Cin,tn) on the MXU."""
    # w_ref: (cout, cin) VMEM, b_ref: (cout, 1) VMEM
    acc = jnp.dot(w_ref[...], x_ref[0], preferred_element_type=jnp.float32)
    o_ref[0] = (acc + b_ref[...]).astype(o_ref.dtype)


@jax.jit
def outconv_forward(x, weight, bias):
    """1x1 Conv2d forward (matches PyTorch nn.Conv2d(kernel_size=1)).

    Args:
      x:      (N, Cin, H, W)   -- NCHW, like PyTorch.
      weight: (Cout, Cin, 1, 1) -- PyTorch Conv2d weight layout.
      bias:   (Cout,)
    Returns:
      (N, Cout, H, W)
    """
    n, cin, h, w_sp = x.shape
    cout = weight.shape[0]
    s = h * w_sp
    itemsize = jnp.dtype(x.dtype).itemsize

    # Free reshapes (NCHW is contiguous): channels on sublanes, spatial on lanes.
    x3 = x.reshape(n, cin, s)
    w2 = weight.reshape(cout, cin)

    # Lane-dense spatial tile: multiple of 128, ~2 MiB per input block, <= 8192.
    tn_cap = ((2 * 1024 * 1024) // (max(cin, 1) * itemsize)) // 128 * 128
    tn_cap = max(128, min(8192, tn_cap))
    if s <= tn_cap:
        tn = s          # whole spatial axis per block (always a legal block)
    else:
        tn = tn_cap     # multiple of 128; a ragged last tile is masked by Pallas

    grid = (n, pl.cdiv(s, tn))

    x_spec = pl.BlockSpec((1, cin, tn), lambda b, sb: (b, 0, sb))
    o_spec = pl.BlockSpec((1, cout, tn), lambda b, sb: (b, 0, sb))

    use_vpu = (cin * cout) <= 256
    if use_vpu:
        kernel = _make_vpu_kernel(cin, cout)
        w_arg, b_arg = w2, bias
        w_spec = pl.BlockSpec(memory_space=pltpu.MemorySpace.SMEM)
        b_spec = pl.BlockSpec(memory_space=pltpu.MemorySpace.SMEM)
    else:
        kernel = _mxu_kernel
        w_arg, b_arg = w2, bias.reshape(cout, 1)
        w_spec = pl.BlockSpec((cout, cin), lambda b, sb: (0, 0))
        b_spec = pl.BlockSpec((cout, 1), lambda b, sb: (0, 0))

    # Scheduling hints: true HBM traffic + FLOPs; explicit scoped-VMEM budget
    # (double-buffered in/out blocks fit easily; capped for v7x's 64 MiB VMEM).
    cost = pl.CostEstimate(
        flops=2 * n * s * cin * cout,
        transcendentals=0,
        bytes_accessed=(n * s * (cin + cout) + cin * cout + cout) * itemsize,
    )
    vmem_limit = int(min(max(32 * 1024 * 1024,
                             4 * (cin + cout) * tn * itemsize),
                         48 * 1024 * 1024))

    y3 = pl.pallas_call(
        kernel,
        out_shape=jax.ShapeDtypeStruct((n, cout, s), x.dtype),
        grid_spec=pltpu.PrefetchScalarGridSpec(
            num_scalar_prefetch=0,
            grid=grid,
            in_specs=[w_spec, b_spec, x_spec],
            out_specs=o_spec,
        ),
        compiler_params=pltpu.CompilerParams(
            dimension_semantics=("parallel", "parallel"),
            vmem_limit_bytes=vmem_limit,
        ),
        cost_estimate=cost,
    )(w_arg, b_arg, x3)

    return y3.reshape(n, cout, h, w_sp)


if __name__ == "__main__":
    # Small shapes consistent with OutConv: batch=2, in_channels=4,
    # out_channels=3, spatial=16x16.
    N, CIN, COUT, H, W = 2, 4, 3, 16, 16

    key = jax.random.PRNGKey(0)
    kx, kw, kb = jax.random.split(key, 3)

    x = jax.random.normal(kx, (N, CIN, H, W), dtype=jnp.float32)
    weight = jax.random.normal(kw, (COUT, CIN, 1, 1), dtype=jnp.float32) * 0.1
    bias = jax.random.normal(kb, (COUT,), dtype=jnp.float32) * 0.1

    y = outconv_forward(x, weight, bias)
    y = jax.block_until_ready(y)

    # Sanity check vs. pure-JAX reference (same math, no Pallas).
    ref = jnp.einsum("nchw,oc->nohw", x, weight.reshape(COUT, CIN)) + bias[
        None, :, None, None
    ]
    assert y.shape == (N, COUT, H, W)
    assert jnp.allclose(y, ref, atol=1e-5, rtol=1e-5)

    print("KERNEL_OK")
</pallas_src>

<mosaic_0001>
module attributes {stable_mosaic.version = 11 : i64} {
  func.func @kernel(%arg0: i32, %arg1: i32, %arg2: memref<3x4xf32, #tpu.memory_space<smem>>, %arg3: memref<3xf32, #tpu.memory_space<smem>>, %arg4: memref<1x4x256xf32, #tpu.memory_space<vmem>>, %arg5: memref<1x3x256xf32, #tpu.memory_space<vmem>>) attributes {dimension_semantics = [#tpu.dimension_semantics<parallel>, #tpu.dimension_semantics<parallel>], iteration_bounds = array<i64: 2, 1>, scalar_prefetch = 0 : i64, scratch_operands = 0 : i64, tpu.core_type = #tpu.core_type<tc>, window_params = [{transform_indices = @transform_0, window_bounds = array<i64: 3, 4>}, {transform_indices = @transform_1, window_bounds = array<i64: 3>}, {transform_indices = @transform_2, window_bounds = array<i64: 1, 4, 256>}, {transform_indices = @transform_3, window_bounds = array<i64: 1, 3, 256>}]} {
    %c0 = arith.constant 0 : index
    %c0_0 = arith.constant 0 : index
    %c0_1 = arith.constant 0 : index
    %0 = vector.load %arg4[%c0, %c0_0, %c0_1] : memref<1x4x256xf32, #tpu.memory_space<vmem>>, vector<1x4x256xf32>
    %1 = vector.shape_cast %0 : vector<1x4x256xf32> to vector<4x256xf32>
    %2 = vector.extract_strided_slice %1 {offsets = [0, 0], sizes = [1, 256], strides = [1, 1]} : vector<4x256xf32> to vector<1x256xf32>
    %c0_2 = arith.constant 0 : index
    %c0_3 = arith.constant 0 : index
    %3 = memref.load %arg2[%c0_2, %c0_3] : memref<3x4xf32, #tpu.memory_space<smem>>
    %4 = vector.broadcast %3 : f32 to vector<1x256xf32>
    %5 = arith.mulf %2, %4 : vector<1x256xf32>
    %6 = vector.extract_strided_slice %1 {offsets = [1, 0], sizes = [1, 256], strides = [1, 1]} : vector<4x256xf32> to vector<1x256xf32>
    %c0_4 = arith.constant 0 : index
    %c1 = arith.constant 1 : index
    %7 = memref.load %arg2[%c0_4, %c1] : memref<3x4xf32, #tpu.memory_space<smem>>
    %8 = vector.broadcast %7 : f32 to vector<1x256xf32>
    %9 = arith.mulf %6, %8 : vector<1x256xf32>
    %10 = arith.addf %5, %9 : vector<1x256xf32>
    %11 = vector.extract_strided_slice %1 {offsets = [2, 0], sizes = [1, 256], strides = [1, 1]} : vector<4x256xf32> to vector<1x256xf32>
    %c0_5 = arith.constant 0 : index
    %c2 = arith.constant 2 : index
    %12 = memref.load %arg2[%c0_5, %c2] : memref<3x4xf32, #tpu.memory_space<smem>>
    %13 = vector.broadcast %12 : f32 to vector<1x256xf32>
    %14 = arith.mulf %11, %13 : vector<1x256xf32>
    %15 = arith.addf %10, %14 : vector<1x256xf32>
    %16 = vector.extract_strided_slice %1 {offsets = [3, 0], sizes = [1, 256], strides = [1, 1]} : vector<4x256xf32> to vector<1x256xf32>
    %c0_6 = arith.constant 0 : index
    %c3 = arith.constant 3 : index
    %17 = memref.load %arg2[%c0_6, %c3] : memref<3x4xf32, #tpu.memory_space<smem>>
    %18 = vector.broadcast %17 : f32 to vector<1x256xf32>
    %19 = arith.mulf %16, %18 : vector<1x256xf32>
    %20 = arith.addf %15, %19 : vector<1x256xf32>
    %c0_7 = arith.constant 0 : index
    %21 = memref.load %arg3[%c0_7] : memref<3xf32, #tpu.memory_space<smem>>
    %22 = vector.broadcast %21 : f32 to vector<1x256xf32>
    %23 = arith.addf %20, %22 : vector<1x256xf32>
    %c0_8 = arith.constant 0 : index
    %c0_9 = arith.constant 0 : index
    %c0_10 = arith.constant 0 : index
    %24 = vector.load %arg5[%c0_8, %c0_9, %c0_10] : memref<1x3x256xf32, #tpu.memory_space<vmem>>, vector<1x1x256xf32>
    %25 = vector.shape_cast %24 : vector<1x1x256xf32> to vector<1x256xf32>
    %26 = vector.shape_cast %23 : vector<1x256xf32> to vector<1x1x256xf32>
    tpu.vector_store %arg5[%c0_8, %c0_9, %c0_10], %26 {strides = array<i32>} : memref<1x3x256xf32, #tpu.memory_space<vmem>>, vector<1x1x256xf32>,
    %27 = vector.extract_strided_slice %1 {offsets = [0, 0], sizes = [1, 256], strides = [1, 1]} : vector<4x256xf32> to vector<1x256xf32>
    %c1_11 = arith.constant 1 : index
    %c0_12 = arith.constant 0 : index
    %28 = memref.load %arg2[%c1_11, %c0_12] : memref<3x4xf32, #tpu.memory_space<smem>>
    %29 = vector.broadcast %28 : f32 to vector<1x256xf32>
    %30 = arith.mulf %27, %29 : vector<1x256xf32>
    %31 = vector.extract_strided_slice %1 {offsets = [1, 0], sizes = [1, 256], strides = [1, 1]} : vector<4x256xf32> to vector<1x256xf32>
    %c1_13 = arith.constant 1 : index
    %c1_14 = arith.constant 1 : index
    %32 = memref.load %arg2[%c1_13, %c1_14] : memref<3x4xf32, #tpu.memory_space<smem>>
    %33 = vector.broadcast %32 : f32 to vector<1x256xf32>
    %34 = arith.mulf %31, %33 : vector<1x256xf32>
    %35 = arith.addf %30, %34 : vector<1x256xf32>
    %36 = vector.extract_strided_slice %1 {offsets = [2, 0], sizes = [1, 256], strides = [1, 1]} : vector<4x256xf32> to vector<1x256xf32>
    %c1_15 = arith.constant 1 : index
    %c2_16 = arith.constant 2 : index
    %37 = memref.load %arg2[%c1_15, %c2_16] : memref<3x4xf32, #tpu.memory_space<smem>>
    %38 = vector.broadcast %37 : f32 to vector<1x256xf32>
    %39 = arith.mulf %36, %38 : vector<1x256xf32>
    %40 = arith.addf %35, %39 : vector<1x256xf32>
    %41 = vector.extract_strided_slice %1 {offsets = [3, 0], sizes = [1, 256], strides = [1, 1]} : vector<4x256xf32> to vector<1x256xf32>
    %c1_17 = arith.constant 1 : index
    %c3_18 = arith.constant 3 : index
    %42 = memref.load %arg2[%c1_17, %c3_18] : memref<3x4xf32, #tpu.memory_space<smem>>
    %43 = vector.broadcast %42 : f32 to vector<1x256xf32>
    %44 = arith.mulf %41, %43 : vector<1x256xf32>
    %45 = arith.addf %40, %44 : vector<1x256xf32>
    %c1_19 = arith.constant 1 : index
    %46 = memref.load %arg3[%c1_19] : memref<3xf32, #tpu.memory_space<smem>>
    %47 = vector.broadcast %46 : f32 to vector<1x256xf32>
    %48 = arith.addf %45, %47 : vector<1x256xf32>
    %c0_20 = arith.constant 0 : index
    %c1_21 = arith.constant 1 : index
    %c0_22 = arith.constant 0 : index
    %49 = vector.load %arg5[%c0_20, %c1_21, %c0_22] : memref<1x3x256xf32, #tpu.memory_space<vmem>>, vector<1x1x256xf32>
    %50 = vector.shape_cast %49 : vector<1x1x256xf32> to vector<1x256xf32>
    %51 = vector.shape_cast %48 : vector<1x256xf32> to vector<1x1x256xf32>
    tpu.vector_store %arg5[%c0_20, %c1_21, %c0_22], %51 {strides = array<i32>} : memref<1x3x256xf32, #tpu.memory_space<vmem>>, vector<1x1x256xf32>,
    %52 = vector.extract_strided_slice %1 {offsets = [0, 0], sizes = [1, 256], strides = [1, 1]} : vector<4x256xf32> to vector<1x256xf32>
    %c2_23 = arith.constant 2 : index
    %c0_24 = arith.constant 0 : index
    %53 = memref.load %arg2[%c2_23, %c0_24] : memref<3x4xf32, #tpu.memory_space<smem>>
    %54 = vector.broadcast %53 : f32 to vector<1x256xf32>
    %55 = arith.mulf %52, %54 : vector<1x256xf32>
    %56 = vector.extract_strided_slice %1 {offsets = [1, 0], sizes = [1, 256], strides = [1, 1]} : vector<4x256xf32> to vector<1x256xf32>
    %c2_25 = arith.constant 2 : index
    %c1_26 = arith.constant 1 : index
    %57 = memref.load %arg2[%c2_25, %c1_26] : memref<3x4xf32, #tpu.memory_space<smem>>
    %58 = vector.broadcast %57 : f32 to vector<1x256xf32>
    %59 = arith.mulf %56, %58 : vector<1x256xf32>
    %60 = arith.addf %55, %59 : vector<1x256xf32>
    %61 = vector.extract_strided_slice %1 {offsets = [2, 0], sizes = [1, 256], strides = [1, 1]} : vector<4x256xf32> to vector<1x256xf32>
    %c2_27 = arith.constant 2 : index
    %c2_28 = arith.constant 2 : index
    %62 = memref.load %arg2[%c2_27, %c2_28] : memref<3x4xf32, #tpu.memory_space<smem>>
    %63 = vector.broadcast %62 : f32 to vector<1x256xf32>
    %64 = arith.mulf %61, %63 : vector<1x256xf32>
    %65 = arith.addf %60, %64 : vector<1x256xf32>
    %66 = vector.extract_strided_slice %1 {offsets = [3, 0], sizes = [1, 256], strides = [1, 1]} : vector<4x256xf32> to vector<1x256xf32>
    %c2_29 = arith.constant 2 : index
    %c3_30 = arith.constant 3 : index
    %67 = memref.load %arg2[%c2_29, %c3_30] : memref<3x4xf32, #tpu.memory_space<smem>>
    %68 = vector.broadcast %67 : f32 to vector<1x256xf32>
    %69 = arith.mulf %66, %68 : vector<1x256xf32>
    %70 = arith.addf %65, %69 : vector<1x256xf32>
    %c2_31 = arith.constant 2 : index
    %71 = memref.load %arg3[%c2_31] : memref<3xf32, #tpu.memory_space<smem>>
    %72 = vector.broadcast %71 : f32 to vector<1x256xf32>
    %73 = arith.addf %70, %72 : vector<1x256xf32>
    %c0_32 = arith.constant 0 : index
    %c2_33 = arith.constant 2 : index
    %c0_34 = arith.constant 0 : index
    %74 = vector.load %arg5[%c0_32, %c2_33, %c0_34] : memref<1x3x256xf32, #tpu.memory_space<vmem>>, vector<1x1x256xf32>
    %75 = vector.shape_cast %74 : vector<1x1x256xf32> to vector<1x256xf32>
    %76 = vector.shape_cast %73 : vector<1x256xf32> to vector<1x1x256xf32>
    tpu.vector_store %arg5[%c0_32, %c2_33, %c0_34], %76 {strides = array<i32>} : memref<1x3x256xf32, #tpu.memory_space<vmem>>, vector<1x1x256xf32>,
    return
  }
  func.func @transform_0(%arg0: i32, %arg1: i32) -> (i32, i32) {
    %c0_i32 = arith.constant 0 : i32
    %c0_i32_0 = arith.constant 0 : i32
    %c0_i32_1 = arith.constant 0 : i32
    return %c0_i32, %c0_i32_0 : i32, i32
  }
  func.func @transform_1(%arg0: i32, %arg1: i32) -> i32 {
    %c0_i32 = arith.constant 0 : i32
    %c0_i32_0 = arith.constant 0 : i32
    return %c0_i32 : i32
  }
  func.func @transform_2(%arg0: i32, %arg1: i32) -> (i32, i32, i32) {
    %c0_i32 = arith.constant 0 : i32
    %c0_i32_0 = arith.constant 0 : i32
    return %arg0, %c0_i32, %arg1 : i32, i32, i32
  }
  func.func @transform_3(%arg0: i32, %arg1: i32) -> (i32, i32, i32) {
    %c0_i32 = arith.constant 0 : i32
    %c0_i32_0 = arith.constant 0 : i32
    return %arg0, %c0_i32, %arg1 : i32, i32, i32
  }
}

</mosaic_0001>

<bundles_post_ra>
// kernel: outconv_forward.1
= control target key start
LH: loop header
LB: loop body
LE: loop exit
PB: predicated region body
PF: predicated region fallthrough
CT: control target
= control target key end

     0   :  { %8 = vsyncpa [#allocation3], 0  ;;  %s713_s0 = inlined_call_operand.vmem [shape: f32[3,4], index: 0, kind: input, shape index: {}]   ;;  %s714_s1 = inlined_call_operand.vmem [shape: f32[3], index: 1, kind: input, shape index: {}]   ;;  %s715_s2 = inlined_call_operand.vmem [shape: f32[2,4,256], index: 2, kind: input, shape index: {}]   ;;  %s716_s3 = inlined_call_operand.vmem [shape: f32[2,3,256], index: 3, kind: output, shape index: {}]  }
   0x1   :  { %9 = vsyncpa [#allocation5], 0  ;;  %s629_s12 = smov 0   ;;  %s631_s13 = smov 0  }
   0x2   :  { %s633_s14 = smov 0  }
   0x3 LB: > { %s459_s15 = sadd.s32 4294967295, %s605_s14   ;;  %s27_s16 = sadd.s32 1, %s601_s13  ;;  %s605_s14 = sphi %s633_s14, %s15_s14   ;;  %s601_s13 = sphi %s631_s13, %s721_s13   ;;  %s597_s12 = sphi %s629_s12, %s720_s12  }
   0x4   : > { %p29_p0 = scmp.ge.s32.totalorder %s27_s16, 2  ;;  %p461_p1 = scmp.ge.s32.totalorder %s605_s14, 1 }
   0x5   : > { %p130_p2 = scmp.lt.s32.totalorder %s605_s14, 3  ;;  %p650_p4 = scmp.eq.s32.totalorder %s459_s15, 0 }
   0x6   : > { %s723_s16 = smov (%p29_p0, %s27_s16), 0  ;;  %s142_s20 = sshll.u32 %s713_s0, 4  ;;  %s143_s20 = int_to_ptr.vmem [resolvable:$true] %s142_s20 }
   0x7   : > { %p131_p3 = pnand %p461_p1, %p130_p2  ;;  %s152_s23 = sshll.u32 %s714_s1, 4  ;;  %s153_s23 = int_to_ptr.vmem [resolvable:$true] %s152_s23 }
   0x8   : > { %s607_s24 = smov [#allocation2]   ;;  %s608_s25 = smov [#allocation4]  }
   0x9   : > { %p508_p5 = pneg %p131_p3 }
   0xa   : > { %178 = sbr.rel (%p131_p3) target bundleno = 54 (0x36), region = 32 }
   0xb   : > { %p509_p6 = pnand %p650_p4, %p508_p5 }
   0xd   : > { %511 = dma.vmem_to_smem (!%p509_p6), %s143_s20, 64, %s607_s24, [#allocation3]  }
   0xe   : > { %514 = dma.vmem_to_smem (!%p509_p6), %s153_s23, 16, %s608_s25, [#allocation5]  }
   0xf   : > { %588 = dma.done.wait (%p650_p4), [#allocation3], 64  }
  0x10   : > { %590 = vsyncadd (%p650_p4), [#allocation3], 4294967232 }
  0x11   : > { %592 = dma.done.wait (%p650_p4), [#allocation5], 16  }
  0x12   : > { %594 = vsyncadd (%p650_p4), [#allocation5], 4294967280 }
  0x13   : > { %190 = sfence }
  0x14   : > { %p218_p7 = scmp.lt.s32.totalorder %s597_s12, 1  ;;  %s238_s26 = sld [smem:[#allocation2]]  ;;  %v273_v15 = vlaneseq  ;;  %vm270_vm0 = vcmask 1040384  }
  0x15   : > { %s472_s27 = sld [smem:[#allocation2 + $0x1]] }
  0x16   : > { %s725_s12 = smov (!%p218_p7, %s597_s12), 1  ;;  %s474_s28 = sld [smem:[#allocation2 + $0x2]]  ;;  %vm685_vm1 = vcmp.lt.s32.totalorder %v273_v15, 256 }
  0x17   : > { %s498_s29 = sshll.u32 %s725_s12, 3  ;;  %s476_s30 = sld [smem:[#allocation2 + $0x3]] }
  0x18   : > { %s225_s6 = scalar_lea.vmem %s715_s2, %s498_s29  ;;  %s680_s7 = sld [smem:[#allocation4]] }
  0x19   : > { %v237_v0 = vld [vmem:[%s225_s6] sm:$0xff]  ;;  %s478_s8 = sld [smem:[#allocation2 + $0x80]]  ;;  %s235_s24 = scalar_lea.vmem %s716_s3, %s498_s29 }
  0x1a   : > { %v239_v1 = vstv %s238_s26  ;;  %s479_s9 = sld [smem:[#allocation2 + $0x81]] }
  0x1b   : > { %v242_v2 = vstv %s472_s27  ;;  %v240_v3 = vmul.f32 %v239_v1, %v237_v0  ;;  %s481_s10 = sld [smem:[#allocation2 + $0x82]] }
  0x1c   : > { %v243_v4 = vmul.f32 %v242_v2, %v237_v0  ;;  %v250_v5 = vstv %s474_s28  ;;  %s483_s11 = sld [smem:[#allocation2 + $0x83]] }
  0x1d   : > { %v251_v7 = vmul.f32 %v250_v5, %v237_v0  ;;  %v258_v8 = vstv %s476_s30  ;;  %s682_s15 = sld [smem:[#allocation4 + $0x1]] }
  0x1e   : > { %v473_v6 = vrot.slane %v243_v4, 9  ;;  %v259_v9 = vmul.f32 %v258_v8, %v237_v0  ;;  %s487_s17 = sld [smem:[#allocation2 + $0x100]]  ;;  %v266_v17 = vstv %s680_s7 }
  0x1f   : > { %v475_v11 = vrot.slane %v251_v7, 10  ;;  %v279_v13 = vstv %s478_s8  ;;  %s488_s18 = sld [smem:[#allocation2 + $0x101]] }
  0x20   : > { %v248_v10 = vadd.f32 %v473_v6, %v240_v3  ;;  %v477_v12 = vrot.slane %v259_v9, 11  ;;  %v282_v16 = vstv %s479_s9  ;;  %s490_s19 = sld [smem:[#allocation2 + $0x102]]  ;;  %v280_v18 = vmul.f32 %v279_v13, %v237_v0 }
  0x21   : > { %v283_v19 = vmul.f32 %v282_v16, %v237_v0  ;;  %v290_v20 = vstv %s481_s10  ;;  %s492_s20 = sld [smem:[#allocation2 + $0x103]] }
  0x22   : > { %v256_v14 = vadd.f32 %v475_v11, %v248_v10  ;;  %v291_v22 = vmul.f32 %v290_v20, %v237_v0  ;;  %v298_v23 = vstv %s483_s11  ;;  %s494_s21 = sld [smem:[#allocation4 + $0x2]] }
  0x23   : > { %v480_v24 = vrot.slane %v283_v19, 9  ;;  %v299_v25 = vmul.f32 %v298_v23, %v237_v0  ;;  %v306_v41 = vstv %s682_s15 }
  0x24   : > { %v264_v21 = vadd.f32 %v477_v12, %v256_v14  ;;  %v482_v27 = vrot.slane %v291_v22, 10  ;;  %v315_v28 = vstv %s487_s17 }
  0x25   : > { %v288_v30 = vadd.f32 %v480_v24, %v280_v18  ;;  %v484_v31 = vrot.slane %v299_v25, 11  ;;  %v318_v32 = vstv %s488_s18  ;;  %v316_v34 = vmul.f32 %v315_v28, %v237_v0 }
  0x26   : > { %v267_v26 = vadd.f32 %v266_v17, %v264_v21  ;;  %v319_v35 = vmul.f32 %v318_v32, %v237_v0  ;;  %v326_v36 = vstv %s490_s19 }
  0x27   : > { %v296_v37 = vadd.f32 %v482_v27, %v288_v30  ;;  %v327_v38 = vmul.f32 %v326_v36, %v237_v0  ;;  %v334_v39 = vstv %s492_s20 }
  0x28   : > { %v269_v33 = vrot.slane %v267_v26, 3  ;;  %v489_v42 = vrot.slane %v319_v35, 9  ;;  %v335_v43 = vmul.f32 %v334_v39, %v237_v0  ;;  %v342_v51 = vstv %s494_s21 }
  0x29   : > { %v304_v44 = vadd.f32 %v484_v31, %v296_v37  ;;  %v491_v45 = vrot.slane %v327_v38, 10 }
  0x2a   : > { %v271_v40 = vsel %vm270_vm0, %v267_v26, %v269_v33  ;;  %v324_v46 = vadd.f32 %v489_v42, %v316_v34  ;;  %v493_v47 = vrot.slane %v335_v43, 11 }
  0x2b   : > { %277 = vst.msk [vmem:[%s235_s24] ss:$4 sm:$0x3] %vm685_vm1, %v271_v40  ;;  %v307_v48 = vadd.f32 %v306_v41, %v304_v44 }
  0x2c   : > { %v332_v49 = vadd.f32 %v491_v45, %v324_v46 }
  0x2d   : > { %v309_v50 = vrot.slane %v307_v48, 3 }
  0x2e   : > { %v340_v52 = vadd.f32 %v493_v47, %v332_v49 }
  0x2f   : > { %v310_v53 = vsel %vm270_vm0, %v307_v48, %v309_v50 }
  0x30   : > { %486 = vst.msk [vmem:[%s235_s24 + $0x1] ss:$4 sm:$0x3] %vm685_vm1, %v310_v53  ;;  %v343_v54 = vadd.f32 %v342_v51, %v340_v52 }
  0x32   : > { %v345_v55 = vrot.slane %v343_v54, 3 }
  0x34   : > { %v346_v56 = vsel %vm270_vm0, %v343_v54, %v345_v55 }
  0x35   : > { %495 = vst.msk [vmem:[%s235_s24 + $0x2] ss:$4 sm:$0x3] %vm685_vm1, %v346_v56 }
  0x36 PF: > { %s15_s14 = sadd.s32 1, %s605_s14   ;;  %s720_s12 = smov %s601_s13 }
  0x37   : > { %p12_p8 = scmp.ge.s32.totalorder %s15_s14, 4   ;;  %s721_s13 = smov %s723_s16 }
  0x39   :  { %14 = sbr.rel (!%p12_p8) target bundleno = 3 (0x3), region = 73 }
  0x3e   :  { %380 = vsyncpa [#allocation3], 1 }
  0x3f   :  { %382 = vsyncpa [#allocation3 + $0x1], 1 }
  0x40   :  { %383 = vsyncpa [#allocation5], 1 }

</bundles_post_ra>
